<compile_context>
chip_gen: v7x
topology: tpu7x:2x2x1
jax: 0.10.0
libtpu: 0.0.40
codegen_flags: <defaults>
</compile_context>

<pallas_src>
import jax
import jax.numpy as jnp
from jax.experimental import pallas as pl
from jax.experimental.pallas import tpu as pltpu

G = 8  # logical rows packed per lane-dense "super-row"


def nocross_kernel(x1_ref, x2_ref, w12_ref, b12_ref, w21_ref, b21_ref,
                   o1_ref, o2_ref):
    x1 = x1_ref[...].astype(jnp.float32)   # (TR, G*L1)  lane-dense super-rows
    x2 = x2_ref[...].astype(jnp.float32)   # (TR, G*L2)

    # input12 for the whole 8-row group: (TR, G*L2) @ (G*L2, G*L1) + bias
    in12 = jnp.dot(x2, w12_ref[...], preferred_element_type=jnp.float32)
    in12 = in12 + b12_ref[...]
    # input21 for the whole 8-row group: (TR, G*L1) @ (G*L1, G*L2) + bias
    in21 = jnp.dot(x1, w21_ref[...], preferred_element_type=jnp.float32)
    in21 = in21 + b21_ref[...]

    o1_ref[...] = (0.5 * x1 + 0.5 * in12).astype(o1_ref.dtype)
    o2_ref[...] = (0.5 * x2 + 0.5 * in21).astype(o2_ref.dtype)


def no_cross_att_forward(input1, input2, w_kg2tx, b_kg2tx, w_tx2kg, b_tx2kg,
                         *, tile_super_rows=2048):
    b, l1, d = input1.shape
    bb, l2, dd = input2.shape
    assert bb == b and dd == d
    bd = b * d

    # raw row-major reshapes == torch .view(-1, l)
    x1f = input1.reshape(bd, l1)
    x2f = input2.reshape(bd, l2)

    n_super = -(-bd // G)                  # cdiv(bd, G)
    pad_rows = n_super * G - bd
    if pad_rows:
        x1f = jnp.pad(x1f, ((0, pad_rows), (0, 0)))
        x2f = jnp.pad(x2f, ((0, pad_rows), (0, 0)))

    # Lane-dense super-row views (contiguous -> free reshapes).
    X1 = x1f.reshape(n_super, G * l1)
    X2 = x2f.reshape(n_super, G * l2)

    # Expand the tiny Linear params into block-diagonal super-row affine maps.
    #   W12[p*l2+k, q*l1+c] = (p==q) * w_kg2tx[c, k]
    #   W21[p*l1+c, q*l2+k] = (p==q) * w_tx2kg[k, c]
    eye = jnp.eye(G, dtype=jnp.float32)
    W12 = jnp.einsum('pq,ck->pkqc', eye,
                     w_kg2tx.astype(jnp.float32)).reshape(G * l2, G * l1)
    B12 = jnp.tile(b_kg2tx.astype(jnp.float32), G).reshape(1, G * l1)
    W21 = jnp.einsum('pq,kc->pcqk', eye,
                     w_tx2kg.astype(jnp.float32)).reshape(G * l1, G * l2)
    B21 = jnp.tile(b_tx2kg.astype(jnp.float32), G).reshape(1, G * l2)

    # Tile choice: multiple of 8 (f32 sublane) or the full extent.
    if n_super > tile_super_rows:
        tr = (tile_super_rows // 8) * 8
        tr = max(tr, 8)
    else:
        tr = n_super
    grid = (pl.cdiv(n_super, tr),)

    flops = 2 * 2 * n_super * (G * l2) * (G * l1)          # the two dots
    bytes_accessed = 4 * (2 * n_super * G * l1 + 2 * n_super * G * l2
                          + W12.size + B12.size + W21.size + B21.size)

    o1_sup, o2_sup = pl.pallas_call(
        nocross_kernel,
        out_shape=(jax.ShapeDtypeStruct((n_super, G * l1), input1.dtype),
                   jax.ShapeDtypeStruct((n_super, G * l2), input2.dtype)),
        grid=grid,
        in_specs=[
            pl.BlockSpec((tr, G * l1), lambda i: (i, 0)),      # X1 stream
            pl.BlockSpec((tr, G * l2), lambda i: (i, 0)),      # X2 stream
            pl.BlockSpec((G * l2, G * l1), lambda i: (0, 0)),  # W12 (resident)
            pl.BlockSpec((1, G * l1), lambda i: (0, 0)),       # B12 (resident)
            pl.BlockSpec((G * l1, G * l2), lambda i: (0, 0)),  # W21 (resident)
            pl.BlockSpec((1, G * l2), lambda i: (0, 0)),       # B21 (resident)
        ],
        out_specs=(
            pl.BlockSpec((tr, G * l1), lambda i: (i, 0)),
            pl.BlockSpec((tr, G * l2), lambda i: (i, 0)),
        ),
        compiler_params=pltpu.CompilerParams(
            dimension_semantics=("parallel",)),
        cost_estimate=pl.CostEstimate(
            flops=flops, transcendentals=0, bytes_accessed=bytes_accessed),
    )(X1, X2, W12, B12, W21, B21)

    o1f = o1_sup.reshape(n_super * G, l1)
    o2f = o2_sup.reshape(n_super * G, l2)
    if pad_rows:
        o1f = o1f[:bd]
        o2f = o2f[:bd]
    output1 = o1f.reshape(b, l1, d)
    output2 = o2f.reshape(b, l2, d)
    return output1, output2


def ref_forward(input1, input2, w_kg2tx, b_kg2tx, w_tx2kg, b_tx2kg):
    """Pure-JAX reference reproducing the PyTorch forward line by line."""
    b, l1, d = input1.shape
    _, l2, _ = input2.shape
    x2f = input2.reshape(-1, l2)
    input12 = x2f @ w_kg2tx.T + b_kg2tx
    output1 = 0.5 * input1 + 0.5 * input12.reshape(b, l1, d)
    x1f = input1.reshape(-1, l1)
    input21 = x1f @ w_tx2kg.T + b_tx2kg
    output2 = 0.5 * input2 + 0.5 * input21.reshape(b, l2, d)
    return output1, output2


def _make_params(key, max_len, l2):
    k3, k4, k5, k6 = jax.random.split(key, 4)
    lim1 = 1.0 / (l2 ** 0.5)
    w_kg2tx = jax.random.uniform(k3, (max_len, l2), jnp.float32, -lim1, lim1)
    b_kg2tx = jax.random.uniform(k4, (max_len,), jnp.float32, -lim1, lim1)
    lim2 = 1.0 / (max_len ** 0.5)
    w_tx2kg = jax.random.uniform(k5, (l2, max_len), jnp.float32, -lim2, lim2)
    b_tx2kg = jax.random.uniform(k6, (l2,), jnp.float32, -lim2, lim2)
    return w_kg2tx, b_kg2tx, w_tx2kg, b_tx2kg


if __name__ == "__main__":
    MAX_LEN = 16          # conf.max_length == L1
    L2 = 3                # kg2tx in_features / tx2kg out_features

    key = jax.random.PRNGKey(0)
    kin1, kin2, kpar, kin1b, kin2b = jax.random.split(key, 5)
    w1, b1, w2, b2 = _make_params(kpar, MAX_LEN, L2)

    # --- case 1: small, single tile (B*D = 64) ---
    B, D = 2, 32
    input1 = jax.random.normal(kin1, (B, MAX_LEN, D), jnp.float32)
    input2 = jax.random.normal(kin2, (B, L2, D), jnp.float32)
    out1, out2 = no_cross_att_forward(input1, input2, w1, b1, w2, b2)
    jax.block_until_ready((out1, out2))
    ref1, ref2 = ref_forward(input1, input2, w1, b1, w2, b2)
    assert out1.shape == (B, MAX_LEN, D) and out2.shape == (B, L2, D)
    assert jnp.allclose(out1, ref1, atol=1e-5, rtol=1e-5)
    assert jnp.allclose(out2, ref2, atol=1e-5, rtol=1e-5)

    # --- case 2: multi-tile grid + B*D not a multiple of 8 (padding + edge block) ---
    Bb, Db = 3, 44        # BD = 132 -> 17 super-rows, tile=8 -> grid of 3
    input1b = jax.random.normal(kin1b, (Bb, MAX_LEN, Db), jnp.float32)
    input2b = jax.random.normal(kin2b, (Bb, L2, Db), jnp.float32)
    out1b, out2b = no_cross_att_forward(input1b, input2b, w1, b1, w2, b2,
                                        tile_super_rows=8)
    jax.block_until_ready((out1b, out2b))
    ref1b, ref2b = ref_forward(input1b, input2b, w1, b1, w2, b2)
    assert jnp.allclose(out1b, ref1b, atol=1e-5, rtol=1e-5)
    assert jnp.allclose(out2b, ref2b, atol=1e-5, rtol=1e-5)

    print("KERNEL_OK")
</pallas_src>

<mosaic_0001>
module attributes {stable_mosaic.version = 11 : i64} {
  func.func @nocross_kernel(%arg0: i32, %arg1: memref<8x128xf32, #tpu.memory_space<vmem>>, %arg2: memref<8x24xf32, #tpu.memory_space<vmem>>, %arg3: memref<24x128xf32, #tpu.memory_space<vmem>>, %arg4: memref<1x128xf32, #tpu.memory_space<vmem>>, %arg5: memref<128x24xf32, #tpu.memory_space<vmem>>, %arg6: memref<1x24xf32, #tpu.memory_space<vmem>>, %arg7: memref<8x128xf32, #tpu.memory_space<vmem>>, %arg8: memref<8x24xf32, #tpu.memory_space<vmem>>) attributes {dimension_semantics = [#tpu.dimension_semantics<parallel>], iteration_bounds = array<i64: 1>, scalar_prefetch = 0 : i64, scratch_operands = 0 : i64, tpu.core_type = #tpu.core_type<tc>, window_params = [{transform_indices = @transform_0, window_bounds = array<i64: 8, 128>}, {transform_indices = @transform_1, window_bounds = array<i64: 8, 24>}, {pipeline_mode = #tpu.pipeline_mode<synchronous>, transform_indices = @transform_2, window_bounds = array<i64: 24, 128>}, {pipeline_mode = #tpu.pipeline_mode<synchronous>, transform_indices = @transform_3, window_bounds = array<i64: 1, 128>}, {pipeline_mode = #tpu.pipeline_mode<synchronous>, transform_indices = @transform_4, window_bounds = array<i64: 128, 24>}, {pipeline_mode = #tpu.pipeline_mode<synchronous>, transform_indices = @transform_5, window_bounds = array<i64: 1, 24>}, {transform_indices = @transform_6, window_bounds = array<i64: 8, 128>}, {transform_indices = @transform_7, window_bounds = array<i64: 8, 24>}]} {
    %c0 = arith.constant 0 : index
    %c0_0 = arith.constant 0 : index
    %0 = vector.load %arg1[%c0, %c0_0] : memref<8x128xf32, #tpu.memory_space<vmem>>, vector<8x128xf32>
    %c0_1 = arith.constant 0 : index
    %c0_2 = arith.constant 0 : index
    %1 = vector.load %arg2[%c0_1, %c0_2] : memref<8x24xf32, #tpu.memory_space<vmem>>, vector<8x24xf32>
    %c0_3 = arith.constant 0 : index
    %c0_4 = arith.constant 0 : index
    %2 = vector.load %arg3[%c0_3, %c0_4] : memref<24x128xf32, #tpu.memory_space<vmem>>, vector<24x128xf32>
    %cst = arith.constant dense<0.000000e+00> : vector<8x128xf32>
    %3 = tpu.matmul %1, %2, %cst {dimension_numbers = #tpu.dot_dimension_numbers<[1], [0], [0], [1], [0, 0, 1, 1], [], []>} : vector<8x24xf32>, vector<24x128xf32>, vector<8x128xf32> -> vector<8x128xf32>
    %c0_5 = arith.constant 0 : index
    %c0_6 = arith.constant 0 : index
    %4 = vector.load %arg4[%c0_5, %c0_6] : memref<1x128xf32, #tpu.memory_space<vmem>>, vector<1x128xf32>
    %5 = vector.broadcast %4 : vector<1x128xf32> to vector<8x128xf32>
    %6 = arith.addf %3, %5 : vector<8x128xf32>
    %c0_7 = arith.constant 0 : index
    %c0_8 = arith.constant 0 : index
    %7 = vector.load %arg5[%c0_7, %c0_8] : memref<128x24xf32, #tpu.memory_space<vmem>>, vector<128x24xf32>
    %cst_9 = arith.constant dense<0.000000e+00> : vector<8x24xf32>
    %8 = tpu.matmul %0, %7, %cst_9 {dimension_numbers = #tpu.dot_dimension_numbers<[1], [0], [0], [1], [0, 0, 1, 1], [], []>} : vector<8x128xf32>, vector<128x24xf32>, vector<8x24xf32> -> vector<8x24xf32>
    %c0_10 = arith.constant 0 : index
    %c0_11 = arith.constant 0 : index
    %9 = vector.load %arg6[%c0_10, %c0_11] : memref<1x24xf32, #tpu.memory_space<vmem>>, vector<1x24xf32>
    %10 = vector.broadcast %9 : vector<1x24xf32> to vector<8x24xf32>
    %11 = arith.addf %8, %10 : vector<8x24xf32>
    %cst_12 = arith.constant 5.000000e-01 : f32
    %12 = vector.broadcast %cst_12 : f32 to vector<8x128xf32>
    %13 = arith.mulf %12, %0 : vector<8x128xf32>
    %cst_13 = arith.constant 5.000000e-01 : f32
    %14 = vector.broadcast %cst_13 : f32 to vector<8x128xf32>
    %15 = arith.mulf %14, %6 : vector<8x128xf32>
    %16 = arith.addf %13, %15 : vector<8x128xf32>
    %c0_14 = arith.constant 0 : index
    %c0_15 = arith.constant 0 : index
    %17 = vector.load %arg7[%c0_14, %c0_15] : memref<8x128xf32, #tpu.memory_space<vmem>>, vector<8x128xf32>
    tpu.vector_store %arg7[%c0_14, %c0_15], %16 {strides = array<i32>} : memref<8x128xf32, #tpu.memory_space<vmem>>, vector<8x128xf32>,
    %cst_16 = arith.constant 5.000000e-01 : f32
    %18 = vector.broadcast %cst_16 : f32 to vector<8x24xf32>
    %19 = arith.mulf %18, %1 : vector<8x24xf32>
    %cst_17 = arith.constant 5.000000e-01 : f32
    %20 = vector.broadcast %cst_17 : f32 to vector<8x24xf32>
    %21 = arith.mulf %20, %11 : vector<8x24xf32>
    %22 = arith.addf %19, %21 : vector<8x24xf32>
    %c0_18 = arith.constant 0 : index
    %c0_19 = arith.constant 0 : index
    %23 = vector.load %arg8[%c0_18, %c0_19] : memref<8x24xf32, #tpu.memory_space<vmem>>, vector<8x24xf32>
    tpu.vector_store %arg8[%c0_18, %c0_19], %22 {strides = array<i32>} : memref<8x24xf32, #tpu.memory_space<vmem>>, vector<8x24xf32>,
    return
  }
  func.func @transform_0(%arg0: i32) -> (i32, i32) {
    %c0_i32 = arith.constant 0 : i32
    %c0_i32_0 = arith.constant 0 : i32
    return %arg0, %c0_i32 : i32, i32
  }
  func.func @transform_1(%arg0: i32) -> (i32, i32) {
    %c0_i32 = arith.constant 0 : i32
    %c0_i32_0 = arith.constant 0 : i32
    return %arg0, %c0_i32 : i32, i32
  }
  func.func @transform_2(%arg0: i32) -> (i32, i32) {
    %c0_i32 = arith.constant 0 : i32
    %c0_i32_0 = arith.constant 0 : i32
    %c0_i32_1 = arith.constant 0 : i32
    return %c0_i32, %c0_i32_0 : i32, i32
  }
  func.func @transform_3(%arg0: i32) -> (i32, i32) {
    %c0_i32 = arith.constant 0 : i32
    %c0_i32_0 = arith.constant 0 : i32
    %c0_i32_1 = arith.constant 0 : i32
    return %c0_i32, %c0_i32_0 : i32, i32
  }
  func.func @transform_4(%arg0: i32) -> (i32, i32) {
    %c0_i32 = arith.constant 0 : i32
    %c0_i32_0 = arith.constant 0 : i32
    %c0_i32_1 = arith.constant 0 : i32
    return %c0_i32, %c0_i32_0 : i32, i32
  }
  func.func @transform_5(%arg0: i32) -> (i32, i32) {
    %c0_i32 = arith.constant 0 : i32
    %c0_i32_0 = arith.constant 0 : i32
    %c0_i32_1 = arith.constant 0 : i32
    return %c0_i32, %c0_i32_0 : i32, i32
  }
  func.func @transform_6(%arg0: i32) -> (i32, i32) {
    %c0_i32 = arith.constant 0 : i32
    %c0_i32_0 = arith.constant 0 : i32
    return %arg0, %c0_i32 : i32, i32
  }
  func.func @transform_7(%arg0: i32) -> (i32, i32) {
    %c0_i32 = arith.constant 0 : i32
    %c0_i32_0 = arith.constant 0 : i32
    return %arg0, %c0_i32 : i32, i32
  }
}

</mosaic_0001>

<bundles_post_ra>
// kernel: tpu_custom_call.1
= control target key start
LH: loop header
LB: loop body
LE: loop exit
PB: predicated region body
PF: predicated region fallthrough
CT: control target
= control target key end

     0   :  { %13 = vsyncpa [#allocation3], 0  ;;  %v390_v3 = vmov 0.0|0.0   ;;  %vm391_vm0 = vmmov 0   ;;  %v392_v6 = vmov 0.0   ;;  %s530_s0 = inlined_call_operand.vmem [shape: f32[8,128], index: 0, kind: input, shape index: {}]   ;;  %s531_s1 = inlined_call_operand.vmem [shape: f32[8,24], index: 1, kind: input, shape index: {}]   ;;  %s532_s2 = inlined_call_operand.vmem [shape: f32[24,128], index: 2, kind: input, shape index: {}]   ;;  %s533_s3 = inlined_call_operand.vmem [shape: f32[1,128], index: 3, kind: input, shape index: {}]   ;;  %s534_s4 = inlined_call_operand.vmem [shape: f32[128,24], index: 4, kind: input, shape index: {}]   ;;  %s535_s5 = inlined_call_operand.vmem [shape: f32[1,24], index: 5, kind: input, shape index: {}]   ;;  %s536_s6 = inlined_call_operand.hbm [shape: f32[8,128], index: 6, kind: output, shape index: {0}]   ;;  %s537_s7 = inlined_call_operand.hbm [shape: f32[8,24], index: 7, kind: output, shape index: {1}]  }
   0x1   :  { %v113_v0 = vld [vmem:[%s534_s4] sm:$0xff]  ;;  %v114_v1 = vld [vmem:[%s534_s4 + $0x8] sm:$0xff]  ;;  %v115_v2 = vld [vmem:[%s534_s4 + $0x10] sm:$0xff]  ;;  %313 = vmatprep.subr.bf16.mxu1 %v390_v3  ;;  %310 = vmatprep.subr.bf16.mxu0 %v390_v3 }
   0x2   :  { %v314_v4 = vpack.c.bf16 %v114_v1, %v113_v0  ;;  %v116_v5 = vld [vmem:[%s534_s4 + $0x18] sm:$0xff]  ;;  %272 = vmatprep.mubr.msk.f32.mxu0 %vm391_vm0, %v392_v6  ;;  %307 = vmatprep.mubr.msk.f32.mxu1 %vm391_vm0, %v392_v6  ;;  %v117_v8 = vld [vmem:[%s534_s4 + $0x20] sm:$0xff]  ;;  %v118_v9 = vld [vmem:[%s534_s4 + $0x28] sm:$0xff] }
   0x3   :  { %v317_v7 = vpack.c.bf16 %v116_v5, %v115_v2  ;;  %v29_v10 = vld [vmem:[%s532_s2] sm:$0xff]  ;;  %v30_v11 = vld [vmem:[%s532_s2 + $0x8] sm:$0xff]  ;;  %v320_v13 = vpack.c.bf16 %v118_v9, %v117_v8 }
   0x4   :  { %315 = vmatpush3.bf16.msra.mxu1 %v314_v4  ;;  %v311_v12 = vpack.c.bf16 %v30_v11, %v29_v10 }
   0x5   :  { %316 = vmatprep.subr.bf16.mxu1 %v390_v3 }
   0x8   :  { %318 = vmatpush3.bf16.msra.mxu1 %v317_v7 }
   0x9   :  { %14 = vsyncpa [#allocation5], 0  ;;  %319 = vmatprep.subr.bf16.mxu1 %v390_v3  ;;  %v119_v14 = vld [vmem:[%s534_s4 + $0x30] sm:$0xff]  ;;  %v120_v15 = vld [vmem:[%s534_s4 + $0x38] sm:$0xff]  ;;  %312 = vmatpush3.bf16.msra.mxu0 %v311_v12  ;;  %vm39_vm1 = vcmask 195584   ;;  %s393_s20 = smov [#allocation2]  }
   0xa   :  { %270 = vmatprep.subr.mxu0 %v392_v6  ;;  %v31_v16 = vld [vmem:[%s532_s2 + $0x10] sm:$0xff]  ;;  %v28_v17 = vld [vmem:[%s531_s1] sm:$0xff]  ;;  %v323_v18 = vpack.c.bf16 %v120_v15, %v119_v14  ;;  %v122_v20 = vld [vmem:[%s534_s4 + $0x48] sm:$0xff]  ;;  %s220_s21 = sshll.u32 %s393_s20, 4  ;;  %s221_s21 = int_to_ptr.vmem [resolvable:$true] %s220_s21 }
   0xb   :  { %v121_v19 = vld [vmem:[%s534_s4 + $0x40] sm:$0xff]  ;;  %v123_v22 = vld [vmem:[%s534_s4 + $0x50] sm:$0xff]  ;;  %v124_v23 = vld [vmem:[%s534_s4 + $0x58] sm:$0xff]  ;;  %p347_p1 = scmp.lt.s32.totalorder %s221_s21, %s221_s21 }
   0xc   :  { %321 = vmatpush3.bf16.msra.mxu1 %v320_v13  ;;  %v326_v21 = vpack.c.bf16 %v122_v20, %v121_v19  ;;  %v329_v24 = vpack.c.bf16 %v124_v23, %v123_v22  ;;  %v125_v25 = vld [vmem:[%s534_s4 + $0x60] sm:$0xff]  ;;  %v126_v26 = vld [vmem:[%s534_s4 + $0x68] sm:$0xff]  ;;  %v127_v28 = vld [vmem:[%s534_s4 + $0x70] sm:$0xff] }
   0xd   :  { %322 = vmatprep.subr.bf16.mxu1 %v390_v3  ;;  %271 = vmatpush3.msra.mxu0 %v31_v16  ;;  %v332_v27 = vpack.c.bf16 %v126_v26, %v125_v25  ;;  %v128_v29 = vld [vmem:[%s534_s4 + $0x78] sm:$0xff]  ;;  %v27_v31 = vld [vmem:[%s530_s0] sm:$0xff]  ;;  %s342_s4 = scalar_lea.vmem %s221_s21, 128 }
   0xe   :  { %273 = vmatmul.mubr.msk.f32.vlgmr.msra.gmra.mrb[0].mxu0 %vm39_vm1, %v28_v17  ;;  %v335_v30 = vpack.c.bf16 %v128_v29, %v127_v28  ;;  %v242_v32 = vld [vmem:[%s533_s3] ss:$0 sm:$0xff]  ;;  %v206_v34 = vmul.f32 0.5, %v27_v31  ;;  %p343_p0 = scmp.ne.s32.totalorder %s221_s21, %s342_s4  ;;  %p348_p2 = scmp.lt.s32.totalorder %s342_s4, %s342_s4 }
  0x10   :  { %324 = vmatpush3.bf16.msra.mxu1 %v323_v18  ;;  %p349_p3 = por %p348_p2, %p347_p1 }
  0x11   :  { %325 = vmatprep.subr.bf16.mxu1 %v390_v3 }
  0x12   :  { %p350_p4 = pnand %p349_p3, %p343_p0 }
  0x14   :  { %327 = vmatpush3.bf16.msra.mxu1 %v326_v21 }
  0x15   :  { %328 = vmatprep.subr.bf16.mxu1 %v390_v3 }
  0x18   :  { %330 = vmatpush3.bf16.msra.mxu1 %v329_v24 }
  0x19   :  { %331 = vmatprep.subr.bf16.mxu1 %v390_v3 }
  0x1c   :  { %333 = vmatpush3.bf16.msra.mxu1 %v332_v27 }
  0x1d   :  { %334 = vmatprep.subr.bf16.mxu1 %v390_v3 }
  0x20   :  { %336 = vmatpush3.bf16.msra.mxu1 %v335_v30 }
  0x23   :  { %308 = vmatmul.mubr.f32.vlgmr.msra.gmra.mrb[0].mxu1 %v27_v31 }
  0xe1   :  { %v109_v33 = vpop.f32.mrb[0].mxu0 }
  0xe2   :  { %v110_v35 = vadd.f32 %v242_v32, %v109_v33  ;;  %v274_v36 = vpop.f32.mrb[1].mxu0 }
  0xe4   :  { %v207_v37 = vmul.f32 0.5, %v110_v35 }
  0xe6   :  { %v208_v38 = vadd.f32 %v207_v37, %v206_v34 }
  0xe8   :  { %209 = vst [vmem:[#allocation2] sm:$0xff] %v208_v38 }
  0xe9   :  { %353 = shalt.err (!%p350_p4)
}
  0xea   :  { %s354_s3 = scalar_lea.hbm %s536_s6, 128 }
  0xeb   :  { %p355_p5 = scmp.ne.s32.totalorder %s536_s6, %s354_s3  ;;  %p358_p6 = scmp.lt.u32.totalorder %s354_s3, %s536_s6 }
  0xed   :  { %p360_p7 = pnand %p358_p6, %p355_p5 }
  0xef   :  { %363 = shalt.err (!%p360_p7)
}
  0xf0   :  { %223 = dma.vmem_to_hbm [thread:$0]  %s221_s21, 128, %s536_s6, [#allocation3]   ;;  %v244_v39 = vld [vmem:[%s535_s5] ss:$0 sm:$0xff]  ;;  %v210_v41 = vmul.f32 0.5, %v28_v17 }
  0xf1   :  { %s394_s29 = smov [#allocation4]  }
  0xf2   :  { %s230_s30 = sshll.u32 %s394_s29, 4  ;;  %s231_s30 = int_to_ptr.vmem [resolvable:$true] %s230_s30 }
  0xf3   :  { %s364_s8 = scalar_lea.vmem %s231_s30, 128  ;;  %p369_p9 = scmp.lt.s32.totalorder %s231_s30, %s231_s30 }
  0xf4   :  { %p365_p8 = scmp.ne.s32.totalorder %s231_s30, %s364_s8  ;;  %p370_p10 = scmp.lt.s32.totalorder %s364_s8, %s364_s8 }
  0xf6   :  { %v202_v40 = vpop.f32.mrb[0].mxu1  ;;  %p371_p11 = por %p370_p10, %p369_p9 }
  0xf7   :  { %v203_v42 = vadd.f32 %v244_v39, %v202_v40  ;;  %v309_v43 = vpop.f32.mrb[1].mxu1 }
  0xf8   :  { %p372_p12 = pnand %p371_p11, %p365_p8 }
  0xf9   :  { %v211_v44 = vmul.f32 0.5, %v203_v42 }
  0xfb   :  { %v212_v45 = vadd.f32 %v211_v44, %v210_v41 }
  0xfd   :  { %213 = vst.msk [vmem:[#allocation4] sm:$0xff] %vm39_vm1, %v212_v45 }
  0xfe   :  { %375 = shalt.err (!%p372_p12)
}
  0xff   :  { %s376_s9 = scalar_lea.hbm %s537_s7, 128 }
 0x100   :  { %p377_p13 = scmp.ne.s32.totalorder %s537_s7, %s376_s9  ;;  %p380_p0 = scmp.lt.u32.totalorder %s376_s9, %s537_s7 }
 0x102   :  { %p382_p1 = pnand %p380_p0, %p377_p13 }
 0x104   :  { %385 = shalt.err (!%p382_p1)
}
 0x105   :  { %233 = dma.vmem_to_hbm [thread:$0]  %s231_s30, 128, %s537_s7, [#allocation5]  }
 0x106   :  { %386 = dma.done.wait [#allocation3], 128  }
 0x107   :  { %387 = vsyncadd [#allocation3], 4294967168 }
 0x108   :  { %388 = dma.done.wait [#allocation5], 128  }
 0x109   :  { %389 = vsyncadd [#allocation5], 4294967168 }
 0x10a   :  { %240 = vsyncpa [#allocation3], 1 }
 0x10b   :  { %241 = vsyncpa [#allocation5], 1 }

</bundles_post_ra>
